<compile_context>
chip_gen: v5e
topology: v5e:2x2
jax: 0.10.0
libtpu: 0.0.40
codegen_flags: <defaults>
</compile_context>

<pallas_src>
import jax
import jax.numpy as jnp
from jax import lax
from jax.experimental import pallas as pl
from jax.experimental.pallas import tpu as pltpu

# --- module hyper-parameters (mirrors Email_Classifier.__init__ defaults) ---
NUM_CLASSES = 2                 # len(possible_outputs)
STRIDE = 3                      # == embedding_dim, used as Conv1d stride
NUM_KERNELS = 3                 # out_channels of each conv branch
KERNEL_SIZES = (3, 4, 5)
NUM_BRANCHES = len(KERNEL_SIZES)
FEAT_DIM = NUM_KERNELS * NUM_BRANCHES        # 9
MAX_K = max(KERNEL_SIZES)                    # 5 window taps total (offsets 0..4)
LANE = 128
SUBLANE = 8

# packed parameter-vector offsets (single f32 SMEM block)
OFF_W = 0                                    # conv taps, [c * MAX_K + t]   (45)
OFF_BIAS = OFF_W + FEAT_DIM * MAX_K          # conv bias, [c]               (9)
OFF_WFC = OFF_BIAS + FEAT_DIM                # fc weight, [c*NUM_CLASSES+cls] (18)
OFF_BFC = OFF_WFC + FEAT_DIM * NUM_CLASSES   # fc bias, [cls]               (2)
P_TOTAL = OFF_BFC + NUM_CLASSES              # 74

VMEM_TILE_BUDGET = 12 * 1024 * 1024          # conservative per-tile working set


def email_classifier_kernel(x_ref, mask_ref, p_ref, out_ref):
    """One batch tile of the fully fused forward pass.

    x_ref   : (3, Gsub, TB) f32  x[j, g, b] = email[b, 3*g + j]  (batch on lanes)
    mask_ref: (3, Gsub, 1)  f32  per-branch validity (1.0 where g < T_k), resident
    p_ref   : (P_TOTAL,)    f32  packed conv + FC params in SMEM (scalar reads)
    out_ref : (2, TB)       f32  sigmoid probabilities, class-major (lane-dense)
    """
    gsub, tb = x_ref.shape[1], x_ref.shape[2]

    # Window taps 0..2 are the three rows of the current stride group; taps 3..4 are
    # the first two rows of the *next* group, built with sublane rotates of only the
    # two planes that are consumed.  Wrap-around at g = Gsub-1 is harmless:
    # T_4, T_5 <= G-1 <= Gsub-1, so that position is always masked out below.
    x0 = x_ref[0]
    x1 = x_ref[1]
    x2 = x_ref[2]
    x3 = pltpu.roll(x0, shift=gsub - 1, axis=0)
    x4 = pltpu.roll(x1, shift=gsub - 1, axis=0)
    taps = (x0, x1, x2, x3, x4)

    # Hoisted lane-broadcast of the host-precomputed per-branch masks (3 total).
    masks = tuple(jnp.broadcast_to(mask_ref[br], (gsub, tb))
                  for br in range(NUM_BRANCHES))

    # Conv + ReLU + masked global max-pool per channel; the 9x2 FC head is folded in
    # as scalar MACs (far too small for the MXU).  All weights are SMEM scalars.
    logits = [None] * NUM_CLASSES
    for c in range(FEAT_DIM):                        # unrolled: 9 channels
        br = c // NUM_KERNELS
        k = KERNEL_SIZES[br]
        acc = p_ref[OFF_W + c * MAX_K] * taps[0] + p_ref[OFF_BIAS + c]
        for t in range(1, k):
            acc = acc + p_ref[OFF_W + c * MAX_K + t] * taps[t]
        # Masking with 0.0 is safe only because the ReLU output is >= 0.
        pooled = jnp.max(jnp.maximum(acc, 0.0) * masks[br], axis=0, keepdims=True)
        for cls in range(NUM_CLASSES):
            term = p_ref[OFF_WFC + c * NUM_CLASSES + cls] * pooled
            logits[cls] = term if logits[cls] is None else logits[cls] + term

    # dropout(p=0.5) is identity at inference; sigmoid runs on the EUP.
    for cls in range(NUM_CLASSES):
        out_ref[pl.ds(cls, 1), :] = jax.nn.sigmoid(
            logits[cls] + p_ref[OFF_BFC + cls]).astype(out_ref.dtype)


def _round_up(v, m):
    return ((v + m - 1) // m) * m


def _pack_params(params):
    """Flatten conv + FC params into one SMEM-resident f32 vector.

    Channel order matches torch.cat: [k=3 ch0..2, k=4 ch0..2, k=5 ch0..2].
    Conv tap weights are zero-padded to MAX_K taps per channel.
    """
    rows, biases = [], []
    for (w, b), k in zip(params["convs"], KERNEL_SIZES):
        wt = w.T                                      # (out_ch=3, taps=k)
        rows.append(jnp.pad(wt, ((0, 0), (0, MAX_K - k))))
        biases.append(b.reshape(NUM_KERNELS))
    wall = jnp.concatenate(rows, axis=0)              # (9, 5)
    bias = jnp.concatenate(biases, axis=0)            # (9,)
    wfc, bfc = params["fc"]                           # (9, 2), (1, 2)
    packed = jnp.concatenate(
        [wall.reshape(-1), bias, wfc.reshape(-1), bfc.reshape(-1)]
    ).astype(jnp.float32)
    assert packed.shape == (P_TOTAL,)
    return packed


def _choose_batch_tile(B, Gsub, batch_tile):
    """Batch tile on the lane axis: a multiple of 128, or the whole (small) batch."""
    if batch_tile is not None:
        TB = batch_tile if batch_tile >= B else _round_up(batch_tile, LANE)
        return TB, _round_up(B, TB)
    if B <= LANE:
        return B, B                                   # single step, full-array block
    B_pad = _round_up(B, LANE)
    # VMEM cap: double-buffered (3, Gsub, TB) input + ~8 live (Gsub, TB) f32 temps.
    cap = max(LANE, (VMEM_TILE_BUDGET // (64 * Gsub)) // LANE * LANE)
    # Keep >= 2 grid steps when possible so ("parallel",) shards across v7x's 2 cores.
    half = max(LANE, (B_pad // 2) // LANE * LANE)
    TB = min(1024, cap, half)
    return TB, _round_up(B_pad, TB)


def email_classifier_forward(x, params, *, batch_tile=None):
    """x: (B, L) f32 'vectorised email' (torch forward does x.unsqueeze(1))."""
    x = x.astype(jnp.float32)
    B, L = x.shape
    s = STRIDE
    G = -(-L // s)                                    # number of stride groups
    Gsub = max(SUBLANE, _round_up(G, SUBLANE))        # sublane-aligned group count

    # Valid conv output length per kernel size: floor((L - k)/stride) + 1.
    # TODO(synk): if L < k PyTorch's Conv1d raises; here that branch just pools to 0.
    valid_ts = [max((L - k) // s + 1, 0) for k in KERNEL_SIZES]
    g_idx = jnp.arange(Gsub, dtype=jnp.int32)
    mask = jnp.stack(
        [(g_idx < t).astype(jnp.float32) for t in valid_ts])[:, :, None]  # (3,Gsub,1)

    TB, B_pad = _choose_batch_tile(B, Gsub, batch_tile)
    grid_len = B_pad // TB

    # Lane-dense layout: x_t[j, g, b] = email[b, 3*g + j]  (batch on lanes).
    xp = jnp.pad(x, ((0, B_pad - B), (0, Gsub * s - L)))
    x_t = xp.reshape(B_pad, Gsub, s).transpose(2, 1, 0)   # (3, Gsub, B_pad)

    pvec = _pack_params(params)

    mac_flops = 2 * sum(KERNEL_SIZES) * NUM_KERNELS        # 72 per (g, b)
    flops = (B_pad * Gsub * (mac_flops + 2 * FEAT_DIM)
             + B_pad * 2 * FEAT_DIM * NUM_CLASSES)
    bytes_accessed = 4 * (x_t.size + mask.size + pvec.size + B_pad * NUM_CLASSES)

    out = pl.pallas_call(
        email_classifier_kernel,
        out_shape=jax.ShapeDtypeStruct((NUM_CLASSES, B_pad), jnp.float32),
        grid=(grid_len,),
        in_specs=[
            pl.BlockSpec((s, Gsub, TB), lambda i: (0, 0, i)),
            pl.BlockSpec((NUM_BRANCHES, Gsub, 1), lambda i: (0, 0, 0)),
            pl.BlockSpec(memory_space=pltpu.MemorySpace.SMEM),
        ],
        out_specs=pl.BlockSpec((NUM_CLASSES, TB), lambda i: (0, i)),
        compiler_params=pltpu.CompilerParams(
            dimension_semantics=("parallel",),        # megacore sharding on v7x
            vmem_limit_bytes=32 * 1024 * 1024,        # safe on v5e/v6e/v7x
        ),
        cost_estimate=pl.CostEstimate(
            flops=flops,
            transcendentals=B_pad * NUM_CLASSES,
            bytes_accessed=bytes_accessed,
        ),
    )(x_t, mask, pvec)

    return out[:, :B].T                               # (B, NUM_CLASSES)


def init_params(key):
    """Deterministic synthetic parameters with the module's shapes.

    Conv1d(1, 3, k) weight is torch-shape (3, 1, k); stored transposed as (k, 3).
    Linear(9, 2) weight is torch-shape (2, 9); stored as (9, 2).
    """
    ks = jax.random.split(key, 2 * len(KERNEL_SIZES) + 2)
    convs = []
    for i, k in enumerate(KERNEL_SIZES):
        w = 0.3 * jax.random.normal(ks[2 * i], (k, NUM_KERNELS), jnp.float32)
        b = 0.1 * jax.random.normal(ks[2 * i + 1], (1, NUM_KERNELS), jnp.float32)
        convs.append((w, b))
    wfc = 0.3 * jax.random.normal(ks[-2], (FEAT_DIM, NUM_CLASSES), jnp.float32)
    bfc = 0.1 * jax.random.normal(ks[-1], (1, NUM_CLASSES), jnp.float32)
    return {"convs": convs, "fc": (wfc, bfc)}


def reference_forward(x, params):
    """Pure-JAX reference mirroring the torch forward (correctness check)."""
    B, L = x.shape
    pools = []
    for (w, b), k in zip(params["convs"], KERNEL_SIZES):
        nt = (L - k) // STRIDE + 1
        idx = jnp.arange(nt)[:, None] * STRIDE + jnp.arange(k)[None, :]   # (nt, k)
        patches = x[:, idx]                                               # (B, nt, k)
        y = jnp.einsum("btk,kc->btc", patches, w,
                       precision=lax.Precision.HIGHEST) + b[None]
        y = jnp.maximum(y, 0.0)
        pools.append(jnp.max(y, axis=1))                                  # (B, 3)
    feat = jnp.concatenate(pools, axis=1)                                 # (B, 9)
    logits = jnp.dot(feat, params["fc"][0],
                     precision=lax.Precision.HIGHEST) + params["fc"][1]
    return jax.nn.sigmoid(logits)


if __name__ == "__main__":
    key = jax.random.PRNGKey(0)
    pkey, xkey = jax.random.split(key)
    params = init_params(pkey)

    # small stand-in batches of "vectorised emails" (second case exercises L % 3 != 0)
    for (B, L) in ((2, 30), (5, 23)):
        xkey, sub = jax.random.split(xkey)
        x = jax.random.normal(sub, (B, L), jnp.float32)

        out = jax.block_until_ready(email_classifier_forward(x, params))
        ref = reference_forward(x, params)

        assert out.shape == (B, NUM_CLASSES), out.shape
        assert bool(jnp.all(jnp.isfinite(out)))
        assert jnp.allclose(out, ref, atol=5e-3, rtol=5e-3), (out, ref)

    print("KERNEL_OK")
</pallas_src>

<mosaic_0001>
module attributes {stable_mosaic.version = 11 : i64} {
  func.func @email_classifier_kernel(%arg0: i32, %arg1: memref<3x16x2xf32, #tpu.memory_space<vmem>>, %arg2: memref<3x16x1xf32, #tpu.memory_space<vmem>>, %arg3: memref<74xf32, #tpu.memory_space<smem>>, %arg4: memref<2x2xf32, #tpu.memory_space<vmem>>) attributes {dimension_semantics = [#tpu.dimension_semantics<parallel>], iteration_bounds = array<i64: 1>, scalar_prefetch = 0 : i64, scratch_operands = 0 : i64, tpu.core_type = #tpu.core_type<tc>, window_params = [{transform_indices = @transform_0, window_bounds = array<i64: 3, 16, 2>}, {pipeline_mode = #tpu.pipeline_mode<synchronous>, transform_indices = @transform_1, window_bounds = array<i64: 3, 16, 1>}, {transform_indices = @transform_2, window_bounds = array<i64: 74>}, {transform_indices = @transform_3, window_bounds = array<i64: 2, 2>}]} {
    %c0 = arith.constant 0 : index
    %c0_0 = arith.constant 0 : index
    %c0_1 = arith.constant 0 : index
    %0 = vector.load %arg1[%c0, %c0_0, %c0_1] : memref<3x16x2xf32, #tpu.memory_space<vmem>>, vector<1x16x2xf32>
    %1 = vector.shape_cast %0 : vector<1x16x2xf32> to vector<16x2xf32>
    %c1 = arith.constant 1 : index
    %c0_2 = arith.constant 0 : index
    %c0_3 = arith.constant 0 : index
    %2 = vector.load %arg1[%c1, %c0_2, %c0_3] : memref<3x16x2xf32, #tpu.memory_space<vmem>>, vector<1x16x2xf32>
    %3 = vector.shape_cast %2 : vector<1x16x2xf32> to vector<16x2xf32>
    %c2 = arith.constant 2 : index
    %c0_4 = arith.constant 0 : index
    %c0_5 = arith.constant 0 : index
    %4 = vector.load %arg1[%c2, %c0_4, %c0_5] : memref<3x16x2xf32, #tpu.memory_space<vmem>>, vector<1x16x2xf32>
    %5 = vector.shape_cast %4 : vector<1x16x2xf32> to vector<16x2xf32>
    %c15_i32 = arith.constant 15 : i32
    %6 = tpu.dynamic_rotate %1 by %c15_i32 dim 0 : vector<16x2xf32>, i32 -> vector<16x2xf32>
    %c15_i32_6 = arith.constant 15 : i32
    %7 = tpu.dynamic_rotate %3 by %c15_i32_6 dim 0 : vector<16x2xf32>, i32 -> vector<16x2xf32>
    %c0_7 = arith.constant 0 : index
    %c0_8 = arith.constant 0 : index
    %c0_9 = arith.constant 0 : index
    %8 = vector.load %arg2[%c0_7, %c0_8, %c0_9] : memref<3x16x1xf32, #tpu.memory_space<vmem>>, vector<1x16x1xf32>
    %9 = vector.shape_cast %8 : vector<1x16x1xf32> to vector<16x1xf32>
    %10 = vector.shape_cast %9 : vector<16x1xf32> to vector<16x1xf32>
    %11 = vector.broadcast %10 : vector<16x1xf32> to vector<16x2xf32>
    %c1_10 = arith.constant 1 : index
    %c0_11 = arith.constant 0 : index
    %c0_12 = arith.constant 0 : index
    %12 = vector.load %arg2[%c1_10, %c0_11, %c0_12] : memref<3x16x1xf32, #tpu.memory_space<vmem>>, vector<1x16x1xf32>
    %13 = vector.shape_cast %12 : vector<1x16x1xf32> to vector<16x1xf32>
    %14 = vector.shape_cast %13 : vector<16x1xf32> to vector<16x1xf32>
    %15 = vector.broadcast %14 : vector<16x1xf32> to vector<16x2xf32>
    %c2_13 = arith.constant 2 : index
    %c0_14 = arith.constant 0 : index
    %c0_15 = arith.constant 0 : index
    %16 = vector.load %arg2[%c2_13, %c0_14, %c0_15] : memref<3x16x1xf32, #tpu.memory_space<vmem>>, vector<1x16x1xf32>
    %17 = vector.shape_cast %16 : vector<1x16x1xf32> to vector<16x1xf32>
    %18 = vector.shape_cast %17 : vector<16x1xf32> to vector<16x1xf32>
    %19 = vector.broadcast %18 : vector<16x1xf32> to vector<16x2xf32>
    %c0_16 = arith.constant 0 : index
    %20 = memref.load %arg3[%c0_16] : memref<74xf32, #tpu.memory_space<smem>>
    %21 = vector.broadcast %20 : f32 to vector<16x2xf32>
    %22 = arith.mulf %21, %1 : vector<16x2xf32>
    %c45 = arith.constant 45 : index
    %23 = memref.load %arg3[%c45] : memref<74xf32, #tpu.memory_space<smem>>
    %24 = vector.broadcast %23 : f32 to vector<16x2xf32>
    %25 = arith.addf %22, %24 : vector<16x2xf32>
    %c1_17 = arith.constant 1 : index
    %26 = memref.load %arg3[%c1_17] : memref<74xf32, #tpu.memory_space<smem>>
    %27 = vector.broadcast %26 : f32 to vector<16x2xf32>
    %28 = arith.mulf %27, %3 : vector<16x2xf32>
    %29 = arith.addf %25, %28 : vector<16x2xf32>
    %c2_18 = arith.constant 2 : index
    %30 = memref.load %arg3[%c2_18] : memref<74xf32, #tpu.memory_space<smem>>
    %31 = vector.broadcast %30 : f32 to vector<16x2xf32>
    %32 = arith.mulf %31, %5 : vector<16x2xf32>
    %33 = arith.addf %29, %32 : vector<16x2xf32>
    %cst = arith.constant 0.000000e+00 : f32
    %34 = vector.broadcast %cst : f32 to vector<16x2xf32>
    %35 = arith.maximumf %33, %34 : vector<16x2xf32>
    %36 = arith.mulf %35, %11 : vector<16x2xf32>
    %cst_19 = arith.constant dense<0xFF800000> : vector<2xf32>
    %37 = vector.multi_reduction <maximumf>, %36, %cst_19 [0] : vector<16x2xf32> to vector<2xf32>
    %38 = vector.shape_cast %37 : vector<2xf32> to vector<1x2xf32>
    %c54 = arith.constant 54 : index
    %39 = memref.load %arg3[%c54] : memref<74xf32, #tpu.memory_space<smem>>
    %40 = vector.broadcast %39 : f32 to vector<1x2xf32>
    %41 = arith.mulf %40, %38 : vector<1x2xf32>
    %c55 = arith.constant 55 : index
    %42 = memref.load %arg3[%c55] : memref<74xf32, #tpu.memory_space<smem>>
    %43 = vector.broadcast %42 : f32 to vector<1x2xf32>
    %44 = arith.mulf %43, %38 : vector<1x2xf32>
    %c5 = arith.constant 5 : index
    %45 = memref.load %arg3[%c5] : memref<74xf32, #tpu.memory_space<smem>>
    %46 = vector.broadcast %45 : f32 to vector<16x2xf32>
    %47 = arith.mulf %46, %1 : vector<16x2xf32>
    %c46 = arith.constant 46 : index
    %48 = memref.load %arg3[%c46] : memref<74xf32, #tpu.memory_space<smem>>
    %49 = vector.broadcast %48 : f32 to vector<16x2xf32>
    %50 = arith.addf %47, %49 : vector<16x2xf32>
    %c6 = arith.constant 6 : index
    %51 = memref.load %arg3[%c6] : memref<74xf32, #tpu.memory_space<smem>>
    %52 = vector.broadcast %51 : f32 to vector<16x2xf32>
    %53 = arith.mulf %52, %3 : vector<16x2xf32>
    %54 = arith.addf %50, %53 : vector<16x2xf32>
    %c7 = arith.constant 7 : index
    %55 = memref.load %arg3[%c7] : memref<74xf32, #tpu.memory_space<smem>>
    %56 = vector.broadcast %55 : f32 to vector<16x2xf32>
    %57 = arith.mulf %56, %5 : vector<16x2xf32>
    %58 = arith.addf %54, %57 : vector<16x2xf32>
    %cst_20 = arith.constant 0.000000e+00 : f32
    %59 = vector.broadcast %cst_20 : f32 to vector<16x2xf32>
    %60 = arith.maximumf %58, %59 : vector<16x2xf32>
    %61 = arith.mulf %60, %11 : vector<16x2xf32>
    %cst_21 = arith.constant dense<0xFF800000> : vector<2xf32>
    %62 = vector.multi_reduction <maximumf>, %61, %cst_21 [0] : vector<16x2xf32> to vector<2xf32>
    %63 = vector.shape_cast %62 : vector<2xf32> to vector<1x2xf32>
    %c56 = arith.constant 56 : index
    %64 = memref.load %arg3[%c56] : memref<74xf32, #tpu.memory_space<smem>>
    %65 = vector.broadcast %64 : f32 to vector<1x2xf32>
    %66 = arith.mulf %65, %63 : vector<1x2xf32>
    %67 = arith.addf %41, %66 : vector<1x2xf32>
    %c57 = arith.constant 57 : index
    %68 = memref.load %arg3[%c57] : memref<74xf32, #tpu.memory_space<smem>>
    %69 = vector.broadcast %68 : f32 to vector<1x2xf32>
    %70 = arith.mulf %69, %63 : vector<1x2xf32>
    %71 = arith.addf %44, %70 : vector<1x2xf32>
    %c10 = arith.constant 10 : index
    %72 = memref.load %arg3[%c10] : memref<74xf32, #tpu.memory_space<smem>>
    %73 = vector.broadcast %72 : f32 to vector<16x2xf32>
    %74 = arith.mulf %73, %1 : vector<16x2xf32>
    %c47 = arith.constant 47 : index
    %75 = memref.load %arg3[%c47] : memref<74xf32, #tpu.memory_space<smem>>
    %76 = vector.broadcast %75 : f32 to vector<16x2xf32>
    %77 = arith.addf %74, %76 : vector<16x2xf32>
    %c11 = arith.constant 11 : index
    %78 = memref.load %arg3[%c11] : memref<74xf32, #tpu.memory_space<smem>>
    %79 = vector.broadcast %78 : f32 to vector<16x2xf32>
    %80 = arith.mulf %79, %3 : vector<16x2xf32>
    %81 = arith.addf %77, %80 : vector<16x2xf32>
    %c12 = arith.constant 12 : index
    %82 = memref.load %arg3[%c12] : memref<74xf32, #tpu.memory_space<smem>>
    %83 = vector.broadcast %82 : f32 to vector<16x2xf32>
    %84 = arith.mulf %83, %5 : vector<16x2xf32>
    %85 = arith.addf %81, %84 : vector<16x2xf32>
    %cst_22 = arith.constant 0.000000e+00 : f32
    %86 = vector.broadcast %cst_22 : f32 to vector<16x2xf32>
    %87 = arith.maximumf %85, %86 : vector<16x2xf32>
    %88 = arith.mulf %87, %11 : vector<16x2xf32>
    %cst_23 = arith.constant dense<0xFF800000> : vector<2xf32>
    %89 = vector.multi_reduction <maximumf>, %88, %cst_23 [0] : vector<16x2xf32> to vector<2xf32>
    %90 = vector.shape_cast %89 : vector<2xf32> to vector<1x2xf32>
    %c58 = arith.constant 58 : index
    %91 = memref.load %arg3[%c58] : memref<74xf32, #tpu.memory_space<smem>>
    %92 = vector.broadcast %91 : f32 to vector<1x2xf32>
    %93 = arith.mulf %92, %90 : vector<1x2xf32>
    %94 = arith.addf %67, %93 : vector<1x2xf32>
    %c59 = arith.constant 59 : index
    %95 = memref.load %arg3[%c59] : memref<74xf32, #tpu.memory_space<smem>>
    %96 = vector.broadcast %95 : f32 to vector<1x2xf32>
    %97 = arith.mulf %96, %90 : vector<1x2xf32>
    %98 = arith.addf %71, %97 : vector<1x2xf32>
    %c15 = arith.constant 15 : index
    %99 = memref.load %arg3[%c15] : memref<74xf32, #tpu.memory_space<smem>>
    %100 = vector.broadcast %99 : f32 to vector<16x2xf32>
    %101 = arith.mulf %100, %1 : vector<16x2xf32>
    %c48 = arith.constant 48 : index
    %102 = memref.load %arg3[%c48] : memref<74xf32, #tpu.memory_space<smem>>
    %103 = vector.broadcast %102 : f32 to vector<16x2xf32>
    %104 = arith.addf %101, %103 : vector<16x2xf32>
    %c16 = arith.constant 16 : index
    %105 = memref.load %arg3[%c16] : memref<74xf32, #tpu.memory_space<smem>>
    %106 = vector.broadcast %105 : f32 to vector<16x2xf32>
    %107 = arith.mulf %106, %3 : vector<16x2xf32>
    %108 = arith.addf %104, %107 : vector<16x2xf32>
    %c17 = arith.constant 17 : index
    %109 = memref.load %arg3[%c17] : memref<74xf32, #tpu.memory_space<smem>>
    %110 = vector.broadcast %109 : f32 to vector<16x2xf32>
    %111 = arith.mulf %110, %5 : vector<16x2xf32>
    %112 = arith.addf %108, %111 : vector<16x2xf32>
    %c18 = arith.constant 18 : index
    %113 = memref.load %arg3[%c18] : memref<74xf32, #tpu.memory_space<smem>>
    %114 = vector.broadcast %113 : f32 to vector<16x2xf32>
    %115 = arith.mulf %114, %6 : vector<16x2xf32>
    %116 = arith.addf %112, %115 : vector<16x2xf32>
    %cst_24 = arith.constant 0.000000e+00 : f32
    %117 = vector.broadcast %cst_24 : f32 to vector<16x2xf32>
    %118 = arith.maximumf %116, %117 : vector<16x2xf32>
    %119 = arith.mulf %118, %15 : vector<16x2xf32>
    %cst_25 = arith.constant dense<0xFF800000> : vector<2xf32>
    %120 = vector.multi_reduction <maximumf>, %119, %cst_25 [0] : vector<16x2xf32> to vector<2xf32>
    %121 = vector.shape_cast %120 : vector<2xf32> to vector<1x2xf32>
    %c60 = arith.constant 60 : index
    %122 = memref.load %arg3[%c60] : memref<74xf32, #tpu.memory_space<smem>>
    %123 = vector.broadcast %122 : f32 to vector<1x2xf32>
    %124 = arith.mulf %123, %121 : vector<1x2xf32>
    %125 = arith.addf %94, %124 : vector<1x2xf32>
    %c61 = arith.constant 61 : index
    %126 = memref.load %arg3[%c61] : memref<74xf32, #tpu.memory_space<smem>>
    %127 = vector.broadcast %126 : f32 to vector<1x2xf32>
    %128 = arith.mulf %127, %121 : vector<1x2xf32>
    %129 = arith.addf %98, %128 : vector<1x2xf32>
    %c20 = arith.constant 20 : index
    %130 = memref.load %arg3[%c20] : memref<74xf32, #tpu.memory_space<smem>>
    %131 = vector.broadcast %130 : f32 to vector<16x2xf32>
    %132 = arith.mulf %131, %1 : vector<16x2xf32>
    %c49 = arith.constant 49 : index
    %133 = memref.load %arg3[%c49] : memref<74xf32, #tpu.memory_space<smem>>
    %134 = vector.broadcast %133 : f32 to vector<16x2xf32>
    %135 = arith.addf %132, %134 : vector<16x2xf32>
    %c21 = arith.constant 21 : index
    %136 = memref.load %arg3[%c21] : memref<74xf32, #tpu.memory_space<smem>>
    %137 = vector.broadcast %136 : f32 to vector<16x2xf32>
    %138 = arith.mulf %137, %3 : vector<16x2xf32>
    %139 = arith.addf %135, %138 : vector<16x2xf32>
    %c22 = arith.constant 22 : index
    %140 = memref.load %arg3[%c22] : memref<74xf32, #tpu.memory_space<smem>>
    %141 = vector.broadcast %140 : f32 to vector<16x2xf32>
    %142 = arith.mulf %141, %5 : vector<16x2xf32>
    %143 = arith.addf %139, %142 : vector<16x2xf32>
    %c23 = arith.constant 23 : index
    %144 = memref.load %arg3[%c23] : memref<74xf32, #tpu.memory_space<smem>>
    %145 = vector.broadcast %144 : f32 to vector<16x2xf32>
    %146 = arith.mulf %145, %6 : vector<16x2xf32>
    %147 = arith.addf %143, %146 : vector<16x2xf32>
    %cst_26 = arith.constant 0.000000e+00 : f32
    %148 = vector.broadcast %cst_26 : f32 to vector<16x2xf32>
    %149 = arith.maximumf %147, %148 : vector<16x2xf32>
    %150 = arith.mulf %149, %15 : vector<16x2xf32>
    %cst_27 = arith.constant dense<0xFF800000> : vector<2xf32>
    %151 = vector.multi_reduction <maximumf>, %150, %cst_27 [0] : vector<16x2xf32> to vector<2xf32>
    %152 = vector.shape_cast %151 : vector<2xf32> to vector<1x2xf32>
    %c62 = arith.constant 62 : index
    %153 = memref.load %arg3[%c62] : memref<74xf32, #tpu.memory_space<smem>>
    %154 = vector.broadcast %153 : f32 to vector<1x2xf32>
    %155 = arith.mulf %154, %152 : vector<1x2xf32>
    %156 = arith.addf %125, %155 : vector<1x2xf32>
    %c63 = arith.constant 63 : index
    %157 = memref.load %arg3[%c63] : memref<74xf32, #tpu.memory_space<smem>>
    %158 = vector.broadcast %157 : f32 to vector<1x2xf32>
    %159 = arith.mulf %158, %152 : vector<1x2xf32>
    %160 = arith.addf %129, %159 : vector<1x2xf32>
    %c25 = arith.constant 25 : index
    %161 = memref.load %arg3[%c25] : memref<74xf32, #tpu.memory_space<smem>>
    %162 = vector.broadcast %161 : f32 to vector<16x2xf32>
    %163 = arith.mulf %162, %1 : vector<16x2xf32>
    %c50 = arith.constant 50 : index
    %164 = memref.load %arg3[%c50] : memref<74xf32, #tpu.memory_space<smem>>
    %165 = vector.broadcast %164 : f32 to vector<16x2xf32>
    %166 = arith.addf %163, %165 : vector<16x2xf32>
    %c26 = arith.constant 26 : index
    %167 = memref.load %arg3[%c26] : memref<74xf32, #tpu.memory_space<smem>>
    %168 = vector.broadcast %167 : f32 to vector<16x2xf32>
    %169 = arith.mulf %168, %3 : vector<16x2xf32>
    %170 = arith.addf %166, %169 : vector<16x2xf32>
    %c27 = arith.constant 27 : index
    %171 = memref.load %arg3[%c27] : memref<74xf32, #tpu.memory_space<smem>>
    %172 = vector.broadcast %171 : f32 to vector<16x2xf32>
    %173 = arith.mulf %172, %5 : vector<16x2xf32>
    %174 = arith.addf %170, %173 : vector<16x2xf32>
    %c28 = arith.constant 28 : index
    %175 = memref.load %arg3[%c28] : memref<74xf32, #tpu.memory_space<smem>>
    %176 = vector.broadcast %175 : f32 to vector<16x2xf32>
    %177 = arith.mulf %176, %6 : vector<16x2xf32>
    %178 = arith.addf %174, %177 : vector<16x2xf32>
    %cst_28 = arith.constant 0.000000e+00 : f32
    %179 = vector.broadcast %cst_28 : f32 to vector<16x2xf32>
    %180 = arith.maximumf %178, %179 : vector<16x2xf32>
    %181 = arith.mulf %180, %15 : vector<16x2xf32>
    %cst_29 = arith.constant dense<0xFF800000> : vector<2xf32>
    %182 = vector.multi_reduction <maximumf>, %181, %cst_29 [0] : vector<16x2xf32> to vector<2xf32>
    %183 = vector.shape_cast %182 : vector<2xf32> to vector<1x2xf32>
    %c64 = arith.constant 64 : index
    %184 = memref.load %arg3[%c64] : memref<74xf32, #tpu.memory_space<smem>>
    %185 = vector.broadcast %184 : f32 to vector<1x2xf32>
    %186 = arith.mulf %185, %183 : vector<1x2xf32>
    %187 = arith.addf %156, %186 : vector<1x2xf32>
    %c65 = arith.constant 65 : index
    %188 = memref.load %arg3[%c65] : memref<74xf32, #tpu.memory_space<smem>>
    %189 = vector.broadcast %188 : f32 to vector<1x2xf32>
    %190 = arith.mulf %189, %183 : vector<1x2xf32>
    %191 = arith.addf %160, %190 : vector<1x2xf32>
    %c30 = arith.constant 30 : index
    %192 = memref.load %arg3[%c30] : memref<74xf32, #tpu.memory_space<smem>>
    %193 = vector.broadcast %192 : f32 to vector<16x2xf32>
    %194 = arith.mulf %193, %1 : vector<16x2xf32>
    %c51 = arith.constant 51 : index
    %195 = memref.load %arg3[%c51] : memref<74xf32, #tpu.memory_space<smem>>
    %196 = vector.broadcast %195 : f32 to vector<16x2xf32>
    %197 = arith.addf %194, %196 : vector<16x2xf32>
    %c31 = arith.constant 31 : index
    %198 = memref.load %arg3[%c31] : memref<74xf32, #tpu.memory_space<smem>>
    %199 = vector.broadcast %198 : f32 to vector<16x2xf32>
    %200 = arith.mulf %199, %3 : vector<16x2xf32>
    %201 = arith.addf %197, %200 : vector<16x2xf32>
    %c32 = arith.constant 32 : index
    %202 = memref.load %arg3[%c32] : memref<74xf32, #tpu.memory_space<smem>>
    %203 = vector.broadcast %202 : f32 to vector<16x2xf32>
    %204 = arith.mulf %203, %5 : vector<16x2xf32>
    %205 = arith.addf %201, %204 : vector<16x2xf32>
    %c33 = arith.constant 33 : index
    %206 = memref.load %arg3[%c33] : memref<74xf32, #tpu.memory_space<smem>>
    %207 = vector.broadcast %206 : f32 to vector<16x2xf32>
    %208 = arith.mulf %207, %6 : vector<16x2xf32>
    %209 = arith.addf %205, %208 : vector<16x2xf32>
    %c34 = arith.constant 34 : index
    %210 = memref.load %arg3[%c34] : memref<74xf32, #tpu.memory_space<smem>>
    %211 = vector.broadcast %210 : f32 to vector<16x2xf32>
    %212 = arith.mulf %211, %7 : vector<16x2xf32>
    %213 = arith.addf %209, %212 : vector<16x2xf32>
    %cst_30 = arith.constant 0.000000e+00 : f32
    %214 = vector.broadcast %cst_30 : f32 to vector<16x2xf32>
    %215 = arith.maximumf %213, %214 : vector<16x2xf32>
    %216 = arith.mulf %215, %19 : vector<16x2xf32>
    %cst_31 = arith.constant dense<0xFF800000> : vector<2xf32>
    %217 = vector.multi_reduction <maximumf>, %216, %cst_31 [0] : vector<16x2xf32> to vector<2xf32>
    %218 = vector.shape_cast %217 : vector<2xf32> to vector<1x2xf32>
    %c66 = arith.constant 66 : index
    %219 = memref.load %arg3[%c66] : memref<74xf32, #tpu.memory_space<smem>>
    %220 = vector.broadcast %219 : f32 to vector<1x2xf32>
    %221 = arith.mulf %220, %218 : vector<1x2xf32>
    %222 = arith.addf %187, %221 : vector<1x2xf32>
    %c67 = arith.constant 67 : index
    %223 = memref.load %arg3[%c67] : memref<74xf32, #tpu.memory_space<smem>>
    %224 = vector.broadcast %223 : f32 to vector<1x2xf32>
    %225 = arith.mulf %224, %218 : vector<1x2xf32>
    %226 = arith.addf %191, %225 : vector<1x2xf32>
    %c35 = arith.constant 35 : index
    %227 = memref.load %arg3[%c35] : memref<74xf32, #tpu.memory_space<smem>>
    %228 = vector.broadcast %227 : f32 to vector<16x2xf32>
    %229 = arith.mulf %228, %1 : vector<16x2xf32>
    %c52 = arith.constant 52 : index
    %230 = memref.load %arg3[%c52] : memref<74xf32, #tpu.memory_space<smem>>
    %231 = vector.broadcast %230 : f32 to vector<16x2xf32>
    %232 = arith.addf %229, %231 : vector<16x2xf32>
    %c36 = arith.constant 36 : index
    %233 = memref.load %arg3[%c36] : memref<74xf32, #tpu.memory_space<smem>>
    %234 = vector.broadcast %233 : f32 to vector<16x2xf32>
    %235 = arith.mulf %234, %3 : vector<16x2xf32>
    %236 = arith.addf %232, %235 : vector<16x2xf32>
    %c37 = arith.constant 37 : index
    %237 = memref.load %arg3[%c37] : memref<74xf32, #tpu.memory_space<smem>>
    %238 = vector.broadcast %237 : f32 to vector<16x2xf32>
    %239 = arith.mulf %238, %5 : vector<16x2xf32>
    %240 = arith.addf %236, %239 : vector<16x2xf32>
    %c38 = arith.constant 38 : index
    %241 = memref.load %arg3[%c38] : memref<74xf32, #tpu.memory_space<smem>>
    %242 = vector.broadcast %241 : f32 to vector<16x2xf32>
    %243 = arith.mulf %242, %6 : vector<16x2xf32>
    %244 = arith.addf %240, %243 : vector<16x2xf32>
    %c39 = arith.constant 39 : index
    %245 = memref.load %arg3[%c39] : memref<74xf32, #tpu.memory_space<smem>>
    %246 = vector.broadcast %245 : f32 to vector<16x2xf32>
    %247 = arith.mulf %246, %7 : vector<16x2xf32>
    %248 = arith.addf %244, %247 : vector<16x2xf32>
    %cst_32 = arith.constant 0.000000e+00 : f32
    %249 = vector.broadcast %cst_32 : f32 to vector<16x2xf32>
    %250 = arith.maximumf %248, %249 : vector<16x2xf32>
    %251 = arith.mulf %250, %19 : vector<16x2xf32>
    %cst_33 = arith.constant dense<0xFF800000> : vector<2xf32>
    %252 = vector.multi_reduction <maximumf>, %251, %cst_33 [0] : vector<16x2xf32> to vector<2xf32>
    %253 = vector.shape_cast %252 : vector<2xf32> to vector<1x2xf32>
    %c68 = arith.constant 68 : index
    %254 = memref.load %arg3[%c68] : memref<74xf32, #tpu.memory_space<smem>>
    %255 = vector.broadcast %254 : f32 to vector<1x2xf32>
    %256 = arith.mulf %255, %253 : vector<1x2xf32>
    %257 = arith.addf %222, %256 : vector<1x2xf32>
    %c69 = arith.constant 69 : index
    %258 = memref.load %arg3[%c69] : memref<74xf32, #tpu.memory_space<smem>>
    %259 = vector.broadcast %258 : f32 to vector<1x2xf32>
    %260 = arith.mulf %259, %253 : vector<1x2xf32>
    %261 = arith.addf %226, %260 : vector<1x2xf32>
    %c40 = arith.constant 40 : index
    %262 = memref.load %arg3[%c40] : memref<74xf32, #tpu.memory_space<smem>>
    %263 = vector.broadcast %262 : f32 to vector<16x2xf32>
    %264 = arith.mulf %263, %1 : vector<16x2xf32>
    %c53 = arith.constant 53 : index
    %265 = memref.load %arg3[%c53] : memref<74xf32, #tpu.memory_space<smem>>
    %266 = vector.broadcast %265 : f32 to vector<16x2xf32>
    %267 = arith.addf %264, %266 : vector<16x2xf32>
    %c41 = arith.constant 41 : index
    %268 = memref.load %arg3[%c41] : memref<74xf32, #tpu.memory_space<smem>>
    %269 = vector.broadcast %268 : f32 to vector<16x2xf32>
    %270 = arith.mulf %269, %3 : vector<16x2xf32>
    %271 = arith.addf %267, %270 : vector<16x2xf32>
    %c42 = arith.constant 42 : index
    %272 = memref.load %arg3[%c42] : memref<74xf32, #tpu.memory_space<smem>>
    %273 = vector.broadcast %272 : f32 to vector<16x2xf32>
    %274 = arith.mulf %273, %5 : vector<16x2xf32>
    %275 = arith.addf %271, %274 : vector<16x2xf32>
    %c43 = arith.constant 43 : index
    %276 = memref.load %arg3[%c43] : memref<74xf32, #tpu.memory_space<smem>>
    %277 = vector.broadcast %276 : f32 to vector<16x2xf32>
    %278 = arith.mulf %277, %6 : vector<16x2xf32>
    %279 = arith.addf %275, %278 : vector<16x2xf32>
    %c44 = arith.constant 44 : index
    %280 = memref.load %arg3[%c44] : memref<74xf32, #tpu.memory_space<smem>>
    %281 = vector.broadcast %280 : f32 to vector<16x2xf32>
    %282 = arith.mulf %281, %7 : vector<16x2xf32>
    %283 = arith.addf %279, %282 : vector<16x2xf32>
    %cst_34 = arith.constant 0.000000e+00 : f32
    %284 = vector.broadcast %cst_34 : f32 to vector<16x2xf32>
    %285 = arith.maximumf %283, %284 : vector<16x2xf32>
    %286 = arith.mulf %285, %19 : vector<16x2xf32>
    %cst_35 = arith.constant dense<0xFF800000> : vector<2xf32>
    %287 = vector.multi_reduction <maximumf>, %286, %cst_35 [0] : vector<16x2xf32> to vector<2xf32>
    %288 = vector.shape_cast %287 : vector<2xf32> to vector<1x2xf32>
    %c70 = arith.constant 70 : index
    %289 = memref.load %arg3[%c70] : memref<74xf32, #tpu.memory_space<smem>>
    %290 = vector.broadcast %289 : f32 to vector<1x2xf32>
    %291 = arith.mulf %290, %288 : vector<1x2xf32>
    %292 = arith.addf %257, %291 : vector<1x2xf32>
    %c71 = arith.constant 71 : index
    %293 = memref.load %arg3[%c71] : memref<74xf32, #tpu.memory_space<smem>>
    %294 = vector.broadcast %293 : f32 to vector<1x2xf32>
    %295 = arith.mulf %294, %288 : vector<1x2xf32>
    %296 = arith.addf %261, %295 : vector<1x2xf32>
    %c72 = arith.constant 72 : index
    %297 = memref.load %arg3[%c72] : memref<74xf32, #tpu.memory_space<smem>>
    %298 = vector.broadcast %297 : f32 to vector<1x2xf32>
    %299 = arith.addf %292, %298 : vector<1x2xf32>
    %300 = arith.negf %299 : vector<1x2xf32>
    %301 = math.exp %300 : vector<1x2xf32>
    %cst_36 = arith.constant 1.000000e+00 : f32
    %302 = vector.broadcast %cst_36 : f32 to vector<1x2xf32>
    %303 = arith.addf %302, %301 : vector<1x2xf32>
    %304 = arith.divf %302, %303 : vector<1x2xf32>
    %c0_37 = arith.constant 0 : index
    %c0_38 = arith.constant 0 : index
    %305 = vector.load %arg4[%c0_37, %c0_38] : memref<2x2xf32, #tpu.memory_space<vmem>>, vector<1x2xf32>
    tpu.vector_store %arg4[%c0_37, %c0_38], %304 {strides = array<i32>} : memref<2x2xf32, #tpu.memory_space<vmem>>, vector<1x2xf32>,
    %c73 = arith.constant 73 : index
    %306 = memref.load %arg3[%c73] : memref<74xf32, #tpu.memory_space<smem>>
    %307 = vector.broadcast %306 : f32 to vector<1x2xf32>
    %308 = arith.addf %296, %307 : vector<1x2xf32>
    %309 = arith.negf %308 : vector<1x2xf32>
    %310 = math.exp %309 : vector<1x2xf32>
    %cst_39 = arith.constant 1.000000e+00 : f32
    %311 = vector.broadcast %cst_39 : f32 to vector<1x2xf32>
    %312 = arith.addf %311, %310 : vector<1x2xf32>
    %313 = arith.divf %311, %312 : vector<1x2xf32>
    %c1_40 = arith.constant 1 : index
    %c0_41 = arith.constant 0 : index
    %314 = vector.load %arg4[%c1_40, %c0_41] : memref<2x2xf32, #tpu.memory_space<vmem>>, vector<1x2xf32>
    tpu.vector_store %arg4[%c1_40, %c0_41], %313 {strides = array<i32>} : memref<2x2xf32, #tpu.memory_space<vmem>>, vector<1x2xf32>,
    return
  }
  func.func @transform_0(%arg0: i32) -> (i32, i32, i32) {
    %c0_i32 = arith.constant 0 : i32
    %c0_i32_0 = arith.constant 0 : i32
    %c0_i32_1 = arith.constant 0 : i32
    return %c0_i32, %c0_i32_0, %arg0 : i32, i32, i32
  }
  func.func @transform_1(%arg0: i32) -> (i32, i32, i32) {
    %c0_i32 = arith.constant 0 : i32
    %c0_i32_0 = arith.constant 0 : i32
    %c0_i32_1 = arith.constant 0 : i32
    %c0_i32_2 = arith.constant 0 : i32
    return %c0_i32, %c0_i32_0, %c0_i32_1 : i32, i32, i32
  }
  func.func @transform_2(%arg0: i32) -> i32 {
    %c0_i32 = arith.constant 0 : i32
    %c0_i32_0 = arith.constant 0 : i32
    return %c0_i32 : i32
  }
  func.func @transform_3(%arg0: i32) -> (i32, i32) {
    %c0_i32 = arith.constant 0 : i32
    %c0_i32_0 = arith.constant 0 : i32
    return %c0_i32, %arg0 : i32, i32
  }
}

</mosaic_0001>

<bundles_post_ra>
// kernel: tpu_custom_call.1
= control target key start
LH: loop header
LB: loop body
LE: loop exit
PB: predicated region body
PF: predicated region fallthrough
CT: control target
= control target key end

     0   :  { %s1304_s0 = inlined_call_operand.vmem [shape: f32[3,16,2], index: 0, kind: input, shape index: {}]   ;;  %s1305_s1 = inlined_call_operand.vmem [shape: f32[3,16,1], index: 1, kind: input, shape index: {}]   ;;  %s1306_s2 = inlined_call_operand.vmem [shape: f32[74], index: 2, kind: input, shape index: {}]   ;;  %s1307_s3 = inlined_call_operand.hbm [shape: f32[2,2], index: 3, kind: output, shape index: {}]  }
   0x1   :  { %1334 = sst [smem:[#allocation25_spill]] %s1307_s3 }
   0x2   :  { %8 = vsyncpa [#allocation4], 0 }
   0x3   :  { %9 = vsyncpa [#allocation3], 0  ;;  %s19_s14 = sshll.u32 %s1306_s2, 4  ;;  %s699_s15 = smov [#allocation2]   ;;  %s20_s14 = int_to_ptr.vmem [resolvable:$true] %s19_s14 }
   0x4   :  { %22 = dma.vmem_to_smem %s20_s14, 16, %s699_s15, [#allocation4]  }
   0x5   :  { %695 = dma.done.wait [#allocation4], 16  }
   0x6   :  { %696 = vsyncadd [#allocation4], 4294967280 }
   0x7   :  { %27 = sfence }
   0x8   :  { %v575_v0 = vld [vmem:[%s1305_s1 + $0x10] sm:$0xff]  ;;  %v47_v1 = vld [vmem:[%s1305_s1] sm:$0xff]  ;;  %v700_v2 = vmov 0   ;;  %v576_v4 = vld [vmem:[%s1305_s1 + $0x18] sm:$0xff]  ;;  %s743_s27 = sld [smem:[#allocation2 + $0x1e]]  ;;  %v38_v9 = vlaneseq  ;;  %vm109_vm1 = vcmask 15360  }
   0x9   :  { %649 = vset.pattern.permute.xlu1 %v700_v2  ;;  %648 = vset.pattern.permute.xlu0 %v700_v2  ;;  %v577_v3 = vld [vmem:[%s1305_s1 + $0x20] sm:$0xff]  ;;  %v48_v5 = vld [vmem:[%s1305_s1 + $0x8] sm:$0xff]  ;;  %s745_s28 = sld [smem:[#allocation2 + $0x33]]  ;;  %v798_v14 = vld [vmem:[%s1304_s0 + $0x10] sm:$0xff]  ;;  %vm529_vm6 = vcmask 8192  }
   0xa   :  { %64 = vperm.xlu1 %649, %v575_v0   ;;  %51 = vperm.xlu0 %648, %v47_v1   ;;  %v578_v6 = vld [vmem:[%s1305_s1 + $0x28] sm:$0xff]  ;;  %s747_s29 = sld [smem:[#allocation2 + $0x1f]]  ;;  %v781_v8 = vld [vmem:[%s1304_s0] sm:$0xff]  ;;  %v803_v16 = vshrl.u32 %v38_v9, 7  ;;  %v856_v34 = vld [vmem:[%s1304_s0 + $0x18] sm:$0xff]  ;;  %v43_v35 = vrot.slane %v798_v14, 1 }
   0xb   :  { %650 = vset.pattern.permute.xlu2 %v700_v2  ;;  %s749_s30 = sld [smem:[#allocation2 + $0x20]]  ;;  %v817_v20 = vld [vmem:[%s1304_s0 + $0x8] sm:$0xff]  ;;  %v830_v24 = vld [vmem:[%s1304_s0 + $0x20] sm:$0xff]  ;;  %v36_v25 = vrot.slane %v781_v8, 1  ;;  %v44_v39 = vrot.slane %v856_v34, 1 }
   0xc   :  { %77 = vperm.xlu2 %650, %v577_v3   ;;  %s751_s4 = sld [smem:[#allocation2 + $0x21]]  ;;  %v37_v26 = vrot.slane %v817_v20, 1  ;;  %vm40_vm0 = vcmp.lt.s32.totalorder %v803_v16, 7 }
   0xd   :  { %s753_s5 = sld [smem:[#allocation2 + $0x22]]  ;;  %v45_v49 = vsel %vm40_vm0, %v43_v35, %v44_v39 }
   0xe   :  { %s755_s6 = sld [smem:[#allocation2 + $0x23]]  ;;  %v349_v7 = vstv %s743_s27  ;;  %v870_v38 = vsel %vm40_vm0, %v36_v25, %v37_v26  ;;  %s701_s27 = smov [#allocation5]  }
   0xf   :  { %s757_s1 = sld [smem:[#allocation2 + $0x34]]  ;;  %v350_v11 = vmul.f32 %v349_v7, %v781_v8  ;;  %v353_v12 = vstv %s745_s28  ;;  %s559_s28 = sshll.u32 %s701_s27, 4  ;;  %s560_s28 = int_to_ptr.vmem [resolvable:$true] %s559_s28 }
  0x10   :  { %s759_s7 = sld [smem:[#allocation2 + $0x24]]  ;;  %v357_v13 = vstv %s747_s29 }
  0x11   :  { %s761_s8 = sld [smem:[#allocation2 + $0x25]]  ;;  %v354_v21 = vadd.f32 %v353_v12, %v350_v11  ;;  %v358_v22 = vmul.f32 %v798_v14, %v357_v13  ;;  %v363_v23 = vstv %s749_s30 }
  0x12   :  { %69 = vperm.xlu1 %649, %v576_v4   ;;  %56 = vperm.xlu0 %648, %v48_v5   ;;  %1335 = sst [smem:[#allocation8_spill]] %s751_s4  ;;  %v369_v30 = vstv %s751_s4  ;;  %v364_v37 = vmul.f32 %v830_v24, %v363_v23 }
  0x13   :  { %1336 = sst [smem:[#allocation9_spill]] %s753_s5  ;;  %v360_v36 = vadd.f32 %v358_v22, %v354_v21  ;;  %v370_v47 = vmul.f32 %v369_v30, %v870_v38  ;;  %v375_v48 = vstv %s753_s5 }
  0x14   :  { %82 = vperm.xlu2 %650, %v578_v6   ;;  %s763_s9 = sld [smem:[#allocation2 + $0x26]]  ;;  %v402_v10 = vstv %s755_s6  ;;  %v376_v60 = vmul.f32 %v375_v48, %v45_v49 }
  0x15   :  { %s765_s10 = sld [smem:[#allocation2 + $0x27]]  ;;  %v403_v17 = vmul.f32 %v402_v10, %v781_v8  ;;  %v406_v18 = vstv %s757_s1  ;;  %v366_v46 = vadd.f32 %v364_v37, %v360_v36 }
  0x16   :  { %s767_s11 = sld [smem:[#allocation2 + $0x28]]  ;;  %v410_v19 = vstv %s759_s7 }
  0x17   :  { %1337 = sst [smem:[#allocation10_spill]] %s761_s8  ;;  %v407_v31 = vadd.f32 %v406_v18, %v403_v17  ;;  %v411_v32 = vmul.f32 %v798_v14, %v410_v19  ;;  %v416_v33 = vstv %s761_s8  ;;  %v372_v59 = vadd.f32 %v370_v47, %v366_v46 }
  0x18   :  { %s769_s12 = sld [smem:[#allocation2 + $0x35]]  ;;  %v417_v44 = vmul.f32 %v830_v24, %v416_v33 }
  0x19   :  { %s771_s13 = sld [smem:[#allocation2 + $0x29]]  ;;  %v413_v43 = vadd.f32 %v411_v32, %v407_v31  ;;  %v944_v11 = vadd.f32 %v376_v60, %v372_v59 }
  0x1a   :  { %1338 = sst [smem:[#allocation11_spill]] %s763_s9  ;;  %v422_v45 = vstv %s763_s9 }
  0x1b   :  { %1339 = sst [smem:[#allocation12_spill]] %s765_s10  ;;  %v419_v54 = vadd.f32 %v417_v44, %v413_v43  ;;  %v423_v55 = vmul.f32 %v422_v45, %v870_v38  ;;  %v1325_v57 = vstv %s765_s10 }
  0x1c   :  { %1340 = sst [smem:[#allocation13_spill]] %s767_s11  ;;  %v455_v15 = vstv %s767_s11  ;;  %v429_v5 = vmul.f32 %v1325_v57, %v45_v49 }
  0x1d   :  { %s773_s14 = sld [smem:[#allocation2 + $0x2a]]  ;;  %v456_v27 = vmul.f32 %v455_v15, %v781_v8  ;;  %v425_v4 = vadd.f32 %v423_v55, %v419_v54 }
  0x1e   :  { %1341 = sst [smem:[#allocation14_spill]] %s769_s12  ;;  %v459_v28 = vstv %s769_s12 }
  0x1f   :  { %1342 = sst [smem:[#allocation15_spill]] %s771_s13  ;;  %v463_v29 = vstv %s771_s13  ;;  %v460_v40 = vadd.f32 %v459_v28, %v456_v27  ;;  %v970_v43 = vadd.f32 %v429_v5, %v425_v4 }
  0x20   :  { %s776_s15 = sld [smem:[#allocation2 + $0x2b]]  ;;  %v464_v41 = vmul.f32 %v798_v14, %v463_v29 }
  0x21   :  { %s783_s18 = sld [smem:[#allocation2 + $0x2c]] }
  0x22   :  { %s785_s19 = sld [smem:[#allocation2 + $0xf]]  ;;  %v466_v50 = vadd.f32 %v464_v41, %v460_v40 }
  0x23   :  { %1343 = sst [smem:[#allocation16_spill]] %s773_s14  ;;  %v469_v42 = vstv %s773_s14 }
  0x24   :  { %s791_s20 = sld [smem:[#allocation2 + $0x30]]  ;;  %v470_v51 = vmul.f32 %v830_v24, %v469_v42 }
  0x25   :  { %s800_s22 = sld [smem:[#allocation2 + $0x10]] }
  0x26   :  { %1344 = sst [smem:[#allocation17_spill]] %s776_s15  ;;  %v1324_v52 = vstv %s776_s15  ;;  %v472_v61 = vadd.f32 %v470_v51, %v466_v50 }
  0x27   :  { %1345 = sst [smem:[#allocation18_spill]] %s783_s18  ;;  %v1323_v58 = vstv %s783_s18  ;;  %v476_v62 = vmul.f32 %v1324_v52, %v870_v38 }
  0x28   :  { %s805_s23 = sld [smem:[#allocation2 + $0x11]]  ;;  %v208_v53 = vstv %s785_s19  ;;  %v482_v17 = vmul.f32 %v1323_v58, %v45_v49 }
  0x29   :  { %s810_s24 = sld [smem:[#allocation2 + $0x12]]  ;;  %v209_v0 = vmul.f32 %v208_v53, %v781_v8  ;;  %v478_v27 = vadd.f32 %v476_v62, %v472_v61 }
  0x2a   :  { %s824_s16 = sld [smem:[#allocation2 + $0x14]]  ;;  %v212_v1 = vstv %s791_s20 }
  0x2b   :  { %s837_s2 = sld [smem:[#allocation2 + $0x31]]  ;;  %v216_v2 = vstv %s800_s22  ;;  %v213_v32 = vadd.f32 %v212_v1, %v209_v0  ;;  %v985_v54 = vadd.f32 %v482_v17, %v478_v27 }
  0x2c   :  { %s842_s25 = sld [smem:[#allocation2 + $0x15]]  ;;  %v217_v36 = vmul.f32 %v798_v14, %v216_v2 }
  0x2d   :  { %s850_s26 = sld [smem:[#allocation2 + $0x16]] }
  0x2e   :  { %s862_s3 = sld [smem:[#allocation2 + $0x17]]  ;;  %v222_v37 = vstv %s805_s23  ;;  %v219_v59 = vadd.f32 %v217_v36, %v213_v32 }
  0x2f   :  { %s878_s17 = sld [smem:[#allocation2 + $0x19]]  ;;  %v228_v44 = vstv %s810_s24  ;;  %v223_v60 = vmul.f32 %v830_v24, %v222_v37 }
  0x30   :  { %1346 = sst [smem:[#allocation19_spill]] %s824_s16  ;;  %v255_v56 = vstv %s824_s16  ;;  %v229_v47 = vmul.f32 %v228_v44, %v870_v38 }
  0x31   :  { %1347 = sst [smem:[#allocation20_spill]] %s837_s2  ;;  %v256_v3 = vmul.f32 %v255_v56, %v781_v8  ;;  %v259_v6 = vstv %s837_s2  ;;  %v225_v4 = vadd.f32 %v223_v60, %v219_v59  ;;  %v359_v59 = vmul.f32 %v856_v34, %v357_v13 }
  0x32   :  { %1348 = sst [smem:[#allocation21_spill]] %s842_s25  ;;  %v263_v9 = vstv %s842_s25  ;;  %v404_v60 = vmul.f32 %v402_v10, %v817_v20 }
  0x33   :  { %s881_s21 = sld [smem:[#allocation2 + $0x32]]  ;;  %v260_v40 = vadd.f32 %v259_v6, %v256_v3  ;;  %v264_v41 = vmul.f32 %v798_v14, %v263_v9  ;;  %v269_v46 = vstv %s850_s26  ;;  %v1040_v10 = vadd.f32 %v229_v47, %v225_v4 }
  0x34   :  { %s886_s11 = sld [smem:[#allocation2 + $0x1a]]  ;;  %v1327_v49 = vstv %s862_s3  ;;  %v270_v0 = vmul.f32 %v830_v24, %v269_v46  ;;  %v42_v4 = vsel %vm40_vm0, %v37_v26, %v36_v25  ;;  %v218_v26 = vmul.f32 %v856_v34, %v216_v2 }
  0x35   :  { %1349 = sst [smem:[#allocation22_spill]] %s878_s17  ;;  %v302_v63 = vstv %s878_s17  ;;  %v266_v62 = vadd.f32 %v264_v41, %v260_v40 }
  0x36   :  { %s892_s13 = sld [smem:[#allocation2 + $0x1b]]  ;;  %v303_v22 = vmul.f32 %v302_v63, %v781_v8 }
  0x37   :  { %s904_s12 = sld [smem:[#allocation2 + $0x1c]] }
  0x38   :  { %s908_s8 = sld [smem:[#allocation2]] }
  0x39   :  { %s914_s14 = sld [smem:[#allocation2 + $0x2d]]  ;;  %v306_v21 = vstv %s881_s21 }
  0x3a   :  { %s920_s4 = sld [smem:[#allocation2 + $0x1]]  ;;  %v310_v31 = vstv %s886_s11  ;;  %v307_v50 = vadd.f32 %v306_v21, %v303_v22  ;;  %v351_v22 = vmul.f32 %v349_v7, %v817_v20  ;;  %v272_v7 = vadd.f32 %v270_v0, %v266_v62 }
  0x3b   :  { %s929_s9 = sld [smem:[#allocation2 + $0x2]]  ;;  %v311_v51 = vmul.f32 %v798_v14, %v310_v31 }
  0x3c   :  { %s936_s5 = sld [smem:[#allocation2 + $0x5]]  ;;  %v1326_v55 = vstv %s892_s13 }
  0x3d   :  { %s942_s15 = sld [smem:[#allocation2 + $0x2e]]  ;;  %v322_v61 = vstv %s904_s12  ;;  %v313_v27 = vadd.f32 %v311_v51, %v307_v50  ;;  %v317_v32 = vmul.f32 %v830_v24, %v1326_v55  ;;  %v276_v50 = vmul.f32 %v1327_v49, %v870_v38 }
  0x3e   :  { %s952_s16 = sld [smem:[#allocation2 + $0x6]]  ;;  %v1331_v3 = vstv %s908_s8  ;;  %v355_v55 = vadd.f32 %v353_v12, %v351_v22  ;;  %v323_v0 = vmul.f32 %v322_v61, %v870_v38  ;;  %v1038_v12 = vld [vmem:[%s1304_s0 + $0x28] sm:$0xff]  ;;  %v210_v38 = vmul.f32 %v208_v53, %v817_v20 }
  0x3f   :  { %s960_s18 = sld [smem:[#allocation2 + $0x7]]  ;;  %v90_v5 = vstv %s914_s14  ;;  %v319_v62 = vadd.f32 %v317_v32, %v313_v27  ;;  %v87_v49 = vmul.f32 %v1331_v3, %v781_v8  ;;  %v1047_v27 = vadd.f32 %v276_v50, %v272_v7 }
  0x40   :  { %1350 = sst [smem:[#allocation23_spill]] %s920_s4  ;;  %v1328_v17 = vstv %s920_s4  ;;  %v361_v53 = vadd.f32 %v359_v59, %v355_v55  ;;  %v365_v7 = vmul.f32 %v1038_v12, %v363_v23  ;;  %v408_v50 = vadd.f32 %v406_v18, %v404_v60 }
  0x41   :  { %s968_s10 = sld [smem:[#allocation2 + $0xa]]  ;;  %v100_v36 = vstv %s929_s9  ;;  %v95_v32 = vmul.f32 %v798_v14, %v1328_v17  ;;  %v412_v17 = vmul.f32 %v856_v34, %v410_v19  ;;  %v457_v23 = vmul.f32 %v455_v15, %v817_v20 }
  0x42   :  { %1351 = sst [smem:[#allocation24_spill]] %s936_s5  ;;  %v1330_v40 = vstv %s936_s5  ;;  %v101_v3 = vmul.f32 %v830_v24, %v100_v36  ;;  %v214_v19 = vadd.f32 %v212_v1, %v210_v38  ;;  %v371_v59 = vmul.f32 %v369_v30, %v42_v4 }
  0x43   :  { %s974_s17 = sld [smem:[#allocation2 + $0x2f]]  ;;  %v130_v58 = vstv %s942_s15  ;;  %v127_v47 = vmul.f32 %v1330_v40, %v781_v8  ;;  %v91_v40 = vadd.f32 %v90_v5, %v87_v49  ;;  %v257_v49 = vmul.f32 %v255_v56, %v817_v20 }
  0x44   :  { %s983_s2 = sld [smem:[#allocation2 + $0xb]]  ;;  %v134_v51 = vstv %s952_s16  ;;  %v418_v15 = vmul.f32 %v1038_v12, %v416_v33  ;;  %v265_v60 = vmul.f32 %v856_v34, %v263_v9  ;;  %v414_v1 = vadd.f32 %v412_v17, %v408_v50 }
  0x45   :  { %s991_s25 = sld [smem:[#allocation2 + $0xc]]  ;;  %v1333_v52 = vstv %s960_s18  ;;  %v135_v25 = vmul.f32 %v798_v14, %v134_v51  ;;  %v131_v55 = vadd.f32 %v130_v58, %v127_v47  ;;  %v261_v2 = vadd.f32 %v259_v6, %v257_v49 }
  0x46   :  { %v141_v18 = vmul.f32 %v830_v24, %v1333_v52  ;;  %v367_v52 = vadd.f32 %v365_v7, %v361_v53  ;;  %v304_v56 = vmul.f32 %v302_v63, %v817_v20  ;;  %v46_v30 = vsel %vm40_vm0, %v44_v39, %v43_v35  ;;  %s1364_s4 = sld [smem:[#allocation12_spill]] }
  0x47   :  { %v167_v57 = vstv %s968_s10  ;;  %v461_v33 = vadd.f32 %v459_v28, %v457_v23  ;;  %v465_v9 = vmul.f32 %v856_v34, %v463_v29  ;;  %v312_v6 = vmul.f32 %v856_v34, %v310_v31  ;;  %s1366_s5 = sld [smem:[#allocation17_spill]] }
  0x48   :  { %v168_v63 = vmul.f32 %v167_v57, %v781_v8  ;;  %v220_v17 = vadd.f32 %v218_v26, %v214_v19  ;;  %v224_v16 = vmul.f32 %v1038_v12, %v222_v37  ;;  %v308_v35 = vadd.f32 %v306_v21, %v304_v56  ;;  %s1370_s11 = sld [smem:[#allocation23_spill]] }
  0x49   :  { %v171_v41 = vstv %s974_s17  ;;  %v97_v29 = vadd.f32 %v95_v32, %v91_v40  ;;  %v137_v39 = vadd.f32 %v135_v25, %v131_v55  ;;  %v267_v38 = vadd.f32 %v265_v60, %v261_v2  ;;  %s1373_s12 = sld [smem:[#allocation24_spill]] }
  0x4a   :  { %v175_v13 = vstv %s983_s2  ;;  %v271_v31 = vmul.f32 %v1038_v12, %v269_v46  ;;  %v373_v8 = vadd.f32 %v371_v59, %v367_v52  ;;  %v377_v47 = vmul.f32 %v375_v48, %v46_v30  ;;  %s1247_s9 = sld [smem:[#allocation2 + $0x37]] }
  0x4b   :  { %v181_v22 = vstv %s991_s25  ;;  %v420_v53 = vadd.f32 %v418_v15, %v414_v1  ;;  %v424_v7 = vmul.f32 %v422_v45, %v42_v4  ;;  %v467_v37 = vadd.f32 %v465_v9, %v461_v33  ;;  %s1249_s10 = sld [smem:[#allocation2 + $0x38]] }
  0x4c   :  { %v471_v21 = vmul.f32 %v1038_v12, %v469_v42  ;;  %v314_v50 = vadd.f32 %v312_v6, %v308_v35  ;;  %v1365_v23 = vstv %s892_s13  ;;  %v172_v32 = vadd.f32 %v171_v41, %v168_v63  ;;  %s1251_s13 = sld [smem:[#allocation2 + $0x39]] }
  0x4d   :  { %v318_v40 = vmul.f32 %v1038_v12, %v1365_v23  ;;  %v176_v52 = vmul.f32 %v798_v14, %v175_v13  ;;  %v226_v48 = vadd.f32 %v224_v16, %v220_v17  ;;  %v230_v45 = vmul.f32 %v228_v44, %v42_v4  ;;  %s1255_s14 = sld [smem:[#allocation2 + $0x42]] }
  0x4e   :  { %v1150_v46 = vadd.f32 %v323_v0, %v319_v62  ;;  %v1152_v25 = vadd.f32 %v101_v3, %v97_v29  ;;  %v273_v42 = vadd.f32 %v271_v31, %v267_v38  ;;  %v1367_v19 = vstv %s862_s3  ;;  %s1371_s3 = sld [smem:[#allocation18_spill]] }
  0x4f   :  { %v277_v26 = vmul.f32 %v1367_v19, %v42_v4  ;;  %v1156_v49 = vadd.f32 %v141_v18, %v137_v39  ;;  %v379_v55 = vadd.f32 %v377_v47, %v373_v8  ;;  %v426_v59 = vadd.f32 %v424_v7, %v420_v53  ;;  %s1257_s15 = sld [smem:[#allocation2 + $0x3a]] }
  0x50   :  { %v1368_v15 = vstv %s1364_s4  ;;  %v473_v14 = vadd.f32 %v471_v21, %v467_v37  ;;  %v1369_v2 = vstv %s1366_s5  ;;  %v320_v44 = vadd.f32 %v318_v40, %v314_v50  ;;  %s1261_s22 = sld [smem:[#allocation2 + $0x3c]] }
  0x51   :  { %v430_v60 = vmul.f32 %v1368_v15, %v46_v30  ;;  %v477_v56 = vmul.f32 %v1369_v2, %v42_v4  ;;  %v324_v62 = vmul.f32 %v322_v61, %v42_v4  ;;  %v178_v3 = vadd.f32 %v176_v52, %v172_v32  ;;  %s1266_s23 = sld [smem:[#allocation2 + $0x3d]] }
  0x52   :  { %v182_v0 = vmul.f32 %v830_v24, %v181_v22  ;;  %v232_v18 = vadd.f32 %v230_v45, %v226_v48  ;;  %v1372_v33 = vstv %s908_s8  ;;  %v233_v6 = vmax.f32 %v1040_v10, 0.0  ;;  %s1245_s8 = sld [smem:[#allocation2 + $0x36]] }
  0x53   :  { %v88_v9 = vmul.f32 %v1372_v33, %v817_v20  ;;  %v280_v63 = vmax.f32 %v1047_v27, 0.0  ;;  %v327_v17 = vmax.f32 %v1150_v46, 0.0  ;;  %v279_v61 = vadd.f32 %v277_v26, %v273_v42  ;;  %s1269_s24 = sld [smem:[#allocation2 + $0x3e]] }
  0x54   :  { %v105_v24 = vmax.f32 %v1152_v25, 0.0  ;;  %v381_v4 = vmax.f32 %v379_v55, 0.0  ;;  %v432_v35 = vadd.f32 %v430_v60, %v426_v59  ;;  %v1374_v29 = vstv %s1370_s11  ;;  %s1271_s16 = sld [smem:[#allocation2 + $0x3f]] }
  0x55   :  { %v96_v39 = vmul.f32 %v856_v34, %v1374_v29  ;;  %v145_v10 = vmax.f32 %v1156_v49, 0.0  ;;  %v479_v27 = vadd.f32 %v477_v56, %v473_v14  ;;  %v1375_v31 = vstv %s1371_s3  ;;  %s1273_s2 = sld [smem:[#allocation2 + $0x40]] }
  0x56   :  { %v483_v8 = vmul.f32 %v1375_v31, %v46_v30  ;;  %v326_v47 = vadd.f32 %v324_v62, %v320_v44  ;;  %v1376_v53 = vmax.f32 %v944_v11, 0.0  ;;  %v1187_v37 = vadd.f32 %v182_v0, %v178_v3  ;;  %s1275_s25 = sld [smem:[#allocation2 + $0x41]] }
  0x57   :  { %v234_v21 = vmax.f32 %v232_v18, 0.0  ;;  %v92_v50 = vadd.f32 %v90_v5, %v88_v9  ;;  %v281_v23 = vmax.f32 %v279_v61, 0.0  ;;  %v102_v40 = vmul.f32 %v1038_v12, %v100_v36  ;;  %s1277_s26 = sld [smem:[#allocation2 + $0x43]] }
  0x58   :  { %v1377_v32 = vstv %s1373_s12  ;;  %v136_v52 = vmul.f32 %v856_v34, %v134_v51  ;;  %v1378_v11 = vmax.f32 %v970_v43, 0.0  ;;  %v434_v46 = vmax.f32 %v432_v35, 0.0  ;;  %s1281_s17 = sld [smem:[#allocation2 + $0x44]] }
  0x59   :  { %v128_v30 = vmul.f32 %v1377_v32, %v817_v20  ;;  %v98_v25 = vadd.f32 %v96_v39, %v92_v50  ;;  %v485_v42 = vadd.f32 %v483_v8, %v479_v27  ;;  %v328_v19 = vmax.f32 %v326_v47, 0.0  ;;  %s1283_s21 = sld [smem:[#allocation2 + $0x45]] }
  0x5a   :  { %v169_v36 = vmul.f32 %v167_v57, %v817_v20  ;;  %v1379_v49 = vmax.f32 %v985_v54, 0.0  ;;  %v186_v51 = vmax.f32 %v1187_v37, 0.0  ;;  %v1380_v59 = vstv %s960_s18  ;;  %s1259_s18 = sld [smem:[#allocation2 + $0x3b]] }
  0x5b   :  { %v132_v26 = vadd.f32 %v130_v58, %v128_v30  ;;  %v142_v15 = vmul.f32 %v1038_v12, %v1380_v59  ;;  %v104_v2 = vadd.f32 %v102_v40, %v98_v25  ;;  %v177_v29 = vmul.f32 %v856_v34, %v175_v13  ;;  %s1288_s29 = sld [smem:[#allocation2 + $0x46]] }
  0x5c   :  { %v173_v0 = vadd.f32 %v171_v41, %v169_v36  ;;  %v183_v41 = vmul.f32 %v1038_v12, %v181_v22  ;;  %s1290_s6 = sld [smem:[#allocation2 + $0x47]] }
  0x5d   :  { %v138_v56 = vadd.f32 %v136_v52, %v132_v26  ;;  %v106_v9 = vmax.f32 %v104_v2, 0.0  ;;  %s641_s0 = sld [smem:[#allocation2 + $0x48]] }
  0x5e   :  { %v179_v47 = vadd.f32 %v177_v29, %v173_v0  ;;  %s643_s19 = sld [smem:[#allocation2 + $0x49]] }
  0x5f   :  { %s1381_s7 = sld [smem:[#allocation25_spill]] }
  0x65   :  { %s561_s20 = sshll.u32 %s1381_s7, 4  ;;  %s562_s20 = int_to_ptr.hbm [resolvable:$true] %s561_s20 }
  0x66   :  { %v1128_v28 = vpop.permute.xlu2 %77 }
  0x67   :  { %v382_v7 = vmul.f32 %v1376_v53, %v1128_v28  ;;  %v435_v48 = vmul.f32 %v1378_v11, %v1128_v28  ;;  %v488_v55 = vmul.f32 %v1379_v49, %v1128_v28  ;;  %v487_v28 = vmax.f32 %v485_v42, 0.0 }
  0x69   :  { %v384_v58 = vsel %vm109_vm1, %v382_v7, -inf  ;;  %v437_v20 = vsel %vm109_vm1, %v435_v48, -inf  ;;  %v490_v50 = vsel %vm109_vm1, %v488_v55, -inf }
  0x6e   :  { %v83_v38 = vpop.permute.xlu2 %82 }
  0x6f   :  { %v383_v45 = vmul.f32 %v381_v4, %v83_v38  ;;  %v436_v54 = vmul.f32 %v434_v46, %v83_v38  ;;  %v489_v53 = vmul.f32 %v487_v28, %v83_v38 }
  0x71   :  { %v385_v57 = vsel %vm109_vm1, %v383_v45, -inf  ;;  %v491_v45 = vsel %vm109_vm1, %v489_v53, -inf }
  0x72   :  { %v386_v30 = vmax.f32 %v384_v58, %v385_v57  ;;  %v492_v55 = vmax.f32 %v490_v50, %v491_v45  ;;  %v200_v50 = vstv %s1257_s15  ;;  %v251_v45 = vstv %s1266_s23 }
  0x74   :  { %v387_v49 = vrot.slane %v386_v30, 4  ;;  %v493_v57 = vrot.slane %v492_v55, 4 }
  0x7c   :  { %v1160_v1 = vpop.permute.xlu1 %64  ;;  %v1175_v16 = vpop.permute.xlu0 %51 }
  0x7d   :  { %v235_v60 = vmul.f32 %v233_v6, %v1160_v1  ;;  %v282_v18 = vmul.f32 %v280_v63, %v1160_v1  ;;  %v107_v33 = vmul.f32 %v105_v24, %v1175_v16  ;;  %v144_v6 = vadd.f32 %v142_v15, %v138_v56 }
  0x7e   :  { %v329_v4 = vmul.f32 %v327_v17, %v1160_v1  ;;  %v147_v63 = vmul.f32 %v145_v10, %v1175_v16  ;;  %v438_v24 = vsel %vm109_vm1, %v436_v54, -inf  ;;  %v185_v10 = vadd.f32 %v183_v41, %v179_v47 }
  0x7f   :  { %v237_v61 = vsel %vm109_vm1, %v235_v60, -inf  ;;  %v146_v31 = vmax.f32 %v144_v6, 0.0  ;;  %v284_v1 = vsel %vm109_vm1, %v282_v18, -inf  ;;  %v110_v17 = vsel %vm109_vm1, %v107_v33, -inf }
  0x80   :  { %v331_v13 = vsel %vm109_vm1, %v329_v4, -inf  ;;  %v439_v52 = vmax.f32 %v437_v20, %v438_v24  ;;  %v187_v11 = vmax.f32 %v185_v10, 0.0  ;;  %v188_v48 = vmul.f32 %v186_v51, %v1175_v16 }
  0x81   :  { %v388_v20 = vmax.f32 %v386_v30, %v387_v49  ;;  %v120_v6 = vstv %s1245_s8  ;;  %v159_v4 = vstv %s1249_s10 }
  0x82   :  { %v440_v59 = vrot.slane %v439_v52, 4 }
  0x83   :  { %v389_v29 = vrot.slane %v388_v20, 2 }
  0x84   :  { %v70_v5 = vpop.permute.xlu1 %69  ;;  %v57_v3 = vpop.permute.xlu0 %56 }
  0x85   :  { %v236_v43 = vmul.f32 %v234_v21, %v70_v5  ;;  %v283_v14 = vmul.f32 %v281_v23, %v70_v5  ;;  %v330_v62 = vmul.f32 %v328_v19, %v70_v5  ;;  %v108_v27 = vmul.f32 %v106_v9, %v57_v3 }
  0x86   :  { %v148_v21 = vmul.f32 %v146_v31, %v57_v3  ;;  %v149_v23 = vsel %vm109_vm1, %v147_v63, -inf  ;;  %v189_v26 = vmul.f32 %v187_v11, %v57_v3 }
  0x87   :  { %v238_v44 = vsel %vm109_vm1, %v236_v43, -inf  ;;  %v285_v35 = vsel %vm109_vm1, %v283_v14, -inf  ;;  %v332_v8 = vsel %vm109_vm1, %v330_v62, -inf  ;;  %v111_v34 = vsel %vm109_vm1, %v108_v27, -inf }
  0x88   :  { %v239_v39 = vmax.f32 %v237_v61, %v238_v44  ;;  %v286_v7 = vmax.f32 %v284_v1, %v285_v35  ;;  %v112_v37 = vmax.f32 %v110_v17, %v111_v34  ;;  %v333_v22 = vmax.f32 %v331_v13, %v332_v8 }
  0x89   :  { %v150_v32 = vsel %vm109_vm1, %v148_v21, -inf  ;;  %v191_v51 = vsel %vm109_vm1, %v189_v26, -inf  ;;  %v190_v43 = vsel %vm109_vm1, %v188_v48, -inf  ;;  %v441_v44 = vmax.f32 %v439_v52, %v440_v59 }
  0x8a   :  { %v240_v12 = vrot.slane %v239_v39, 4  ;;  %v113_v40 = vrot.slane %v112_v37, 4  ;;  %v151_v38 = vmax.f32 %v149_v23, %v150_v32  ;;  %v287_v46 = vrot.slane %v286_v7, 4 }
  0x8b   :  { %v334_v5 = vrot.slane %v333_v22, 4  ;;  %v192_v58 = vmax.f32 %v190_v43, %v191_v51  ;;  %v123_v61 = vstv %s1247_s9  ;;  %v163_v27 = vstv %s1251_s13 }
  0x8c   :  { %v114_v25 = vmax.f32 %v112_v37, %v113_v40  ;;  %v241_v42 = vmax.f32 %v239_v39, %v240_v12  ;;  %v152_v19 = vrot.slane %v151_v38, 4  ;;  %v288_v15 = vmax.f32 %v286_v7, %v287_v46 }
  0x8d   :  { %v335_v14 = vmax.f32 %v333_v22, %v334_v5  ;;  %v193_v3 = vrot.slane %v192_v58, 4  ;;  %v494_v39 = vmax.f32 %v492_v55, %v493_v57  ;;  %v442_v24 = vrot.slane %v441_v44, 2 }
  0x8e   :  { %v115_v36 = vrot.slane %v114_v25, 2  ;;  %v153_v16 = vmax.f32 %v151_v38, %v152_v19  ;;  %v242_v60 = vrot.slane %v241_v42, 2  ;;  %v289_v62 = vrot.slane %v288_v15, 2 }
  0x8f   :  { %v336_v18 = vrot.slane %v335_v14, 2  ;;  %v194_v35 = vmax.f32 %v192_v58, %v193_v3  ;;  %v390_v7 = vmax.f32 %v388_v20, %v389_v29  ;;  %v495_v37 = vrot.slane %v494_v39, 2 }
  0x90   :  { %v116_v2 = vmax.f32 %v114_v25, %v115_v36  ;;  %v154_v56 = vrot.slane %v153_v16, 2  ;;  %v243_v0 = vmax.f32 %v241_v42, %v242_v60  ;;  %v290_v41 = vmax.f32 %v288_v15, %v289_v62 }
  0x91   :  { %v195_v63 = vrot.slane %v194_v35, 2  ;;  %v337_v47 = vmax.f32 %v335_v14, %v336_v18  ;;  %v443_v22 = vmax.f32 %v441_v44, %v442_v24  ;;  %v204_v23 = vstv %s1259_s18 }
  0x92   :  { %v117_v54 = vrot.slane %v116_v2, 1  ;;  %v155_v28 = vmax.f32 %v153_v16, %v154_v56  ;;  %v244_v8 = vrot.slane %v243_v0, 1  ;;  %v291_v21 = vrot.slane %v290_v41, 1 }
  0x93   :  { %v196_v13 = vmax.f32 %v194_v35, %v195_v63  ;;  %v338_v10 = vrot.slane %v337_v47, 1  ;;  %v391_v38 = vrot.slane %v390_v7, 1  ;;  %v496_v11 = vmax.f32 %v494_v39, %v495_v37 }
  0x94   :  { %v118_v33 = vmax.f32 %v116_v2, %v117_v54  ;;  %v156_v9 = vrot.slane %v155_v28, 1  ;;  %v245_v40 = vmax.f32 %v243_v0, %v244_v8  ;;  %v247_v48 = vstv %s1261_s22 }
  0x95   :  { %v197_v12 = vrot.slane %v196_v13, 1  ;;  %v394_v46 = vstv %s1255_s14  ;;  %v292_v25 = vmax.f32 %v290_v41, %v291_v21  ;;  %v444_v19 = vrot.slane %v443_v22, 1 }
  0x96   :  { %v157_v31 = vmax.f32 %v155_v28, %v156_v9  ;;  %v121_v1 = vmul.f32 %v120_v6, %v118_v33  ;;  %v124_v17 = vmul.f32 %v123_v61, %v118_v33  ;;  %v294_v26 = vstv %s1269_s24 }
  0x97   :  { %v198_v52 = vmax.f32 %v196_v13, %v197_v12  ;;  %v298_v36 = vstv %s1271_s16  ;;  %v339_v49 = vmax.f32 %v337_v47, %v338_v10  ;;  %v248_v55 = vmul.f32 %v247_v48, %v245_v40 }
  0x98   :  { %v160_v53 = vmul.f32 %v159_v4, %v157_v31  ;;  %v164_v34 = vmul.f32 %v163_v27, %v157_v31  ;;  %v252_v16 = vmul.f32 %v251_v45, %v245_v40  ;;  %v392_v59 = vmax.f32 %v390_v7, %v391_v38 }
  0x99   :  { %v201_v42 = vmul.f32 %v200_v50, %v198_v52  ;;  %v205_v5 = vmul.f32 %v204_v23, %v198_v52  ;;  %v497_v15 = vrot.slane %v496_v11, 1  ;;  %v341_v60 = vstv %s1273_s2 }
  0x9a   :  { %v161_v32 = vadd.f32 %v160_v53, %v121_v1  ;;  %v165_v30 = vadd.f32 %v164_v34, %v124_v17  ;;  %v345_v14 = vstv %s1275_s25  ;;  %v295_v2 = vmul.f32 %v294_v26, %v292_v25 }
  0x9b   :  { %v299_v56 = vmul.f32 %v298_v36, %v292_v25  ;;  %v398_v57 = vstv %s1277_s26  ;;  %v445_v54 = vmax.f32 %v443_v22, %v444_v19  ;;  %v342_v28 = vmul.f32 %v341_v60, %v339_v49 }
  0x9c   :  { %v202_v51 = vadd.f32 %v201_v42, %v161_v32  ;;  %v206_v43 = vadd.f32 %v205_v5, %v165_v30  ;;  %v346_v44 = vmul.f32 %v345_v14, %v339_v49  ;;  %v447_v0 = vstv %s1281_s17 }
  0x9d   :  { %v451_v18 = vstv %s1283_s21  ;;  %v395_v33 = vmul.f32 %v394_v46, %v392_v59  ;;  %v399_v9 = vmul.f32 %v398_v57, %v392_v59  ;;  %v498_v6 = vmax.f32 %v496_v11, %v497_v15 }
  0x9e   :  { %v249_v58 = vadd.f32 %v248_v55, %v202_v51  ;;  %v253_v20 = vadd.f32 %v252_v16, %v206_v43  ;;  %v500_v35 = vstv %s1288_s29  ;;  %v504_v29 = vstv %s1290_s6 }
  0x9f   :  { %v448_v39 = vmul.f32 %v447_v0, %v445_v54  ;;  %v452_v27 = vmul.f32 %v451_v18, %v445_v54  ;;  %v501_v63 = vmul.f32 %v500_v35, %v498_v6  ;;  %v505_v24 = vmul.f32 %v504_v29, %v498_v6 }
  0xa0   :  { %v296_v62 = vadd.f32 %v295_v2, %v249_v58  ;;  %v300_v3 = vadd.f32 %v299_v56, %v253_v20  ;;  %v508_v1 = vstv %s641_s0  ;;  %v532_v17 = vstv %s643_s19 }
  0xa2   :  { %v343_v61 = vadd.f32 %v342_v28, %v296_v62  ;;  %v347_v4 = vadd.f32 %v346_v44, %v300_v3 }
  0xa4   :  { %v396_v31 = vadd.f32 %v395_v33, %v343_v61  ;;  %v400_v41 = vadd.f32 %v399_v9, %v347_v4 }
  0xa6   :  { %v449_v8 = vadd.f32 %v448_v39, %v396_v31  ;;  %v453_v47 = vadd.f32 %v452_v27, %v400_v41 }
  0xa8   :  { %v502_v53 = vadd.f32 %v501_v63, %v449_v8  ;;  %v506_v34 = vadd.f32 %v505_v24, %v453_v47 }
  0xaa   :  { %v509_v13 = vadd.f32 %v508_v1, %v502_v53  ;;  %v533_v7 = vadd.f32 %v532_v17, %v506_v34 }
  0xac   :  { %v642_v37 = vmul.f32 -1.442695, %v509_v13  ;;  %v644_v21 = vmul.f32 -1.442695, %v533_v7 }
  0xae   :  { %651 = vpow2.f32 %v642_v37 }
  0xaf   :  { %653 = vpow2.f32 %v644_v21 }
  0xb4   :  { %v652_v12 = vpop.eup %651 }
  0xb5   :  { %v654_v22 = vpop.eup %653  ;;  %v513_v10 = vadd.f32 1.0, %v652_v12 }
  0xb6   :  { %v537_v50 = vadd.f32 1.0, %v654_v22 }
  0xb7   :  { %655 = vrcp.f32 %v513_v10  ;;  %v525_v38 = vand.u32 2147483648, %v513_v10  ;;  %v523_v45 = vand.u32 2147483647, %v513_v10  ;;  %vm519_vm4 = vweird.f32 %v513_v10 }
  0xb8   :  { %657 = vrcp.f32 %v537_v50  ;;  %v549_v46 = vand.u32 2147483648, %v537_v50  ;;  %v547_v42 = vand.u32 2147483647, %v537_v50  ;;  %vm543_vm7 = vweird.f32 %v537_v50 }
  0xb9   :  { %v526_v19 = vor.u32 1.1754944e-38, %v525_v38  ;;  %vm524_vm8 = vcmp.eq.f32.partialorder %v523_v45, 8.507059e+37 }
  0xba   :  { %v550_v49 = vor.u32 1.1754944e-38, %v549_v46  ;;  %vm548_vm10 = vcmp.eq.f32.partialorder %v547_v42, 8.507059e+37 }
  0xbd   :  { %v656_v23 = vpop.eup %655 }
  0xbe   :  { %v658_v40 = vpop.eup %657  ;;  %v515_v32 = vmul.f32 %v656_v23, %v513_v10  ;;  %vm520_vm2 = vweird.f32 %v656_v23 }
  0xbf   :  { %v539_v30 = vmul.f32 %v658_v40, %v537_v50  ;;  %vm544_vm3 = vweird.f32 %v658_v40  ;;  %vm521_vm5 = vmor %vm519_vm4, %vm520_vm2 }
  0xc0   :  { %v516_v52 = vsub.f32 1.0, %v515_v32  ;;  %vm545_vm9 = vmor %vm543_vm7, %vm544_vm3 }
  0xc1   :  { %v540_v11 = vsub.f32 1.0, %v539_v30 }
  0xc2   :  { %v517_v48 = vmul.f32 %v656_v23, %v516_v52 }
  0xc3   :  { %v541_v25 = vmul.f32 %v658_v40, %v540_v11 }
  0xc4   :  { %v518_v5 = vadd.f32 %v656_v23, %v517_v48 }
  0xc5   :  { %v542_v26 = vadd.f32 %v658_v40, %v541_v25 }
  0xc6   :  { %v522_v36 = vsel %vm521_vm5, %v656_v23, %v518_v5 }
  0xc7   :  { %v527_v55 = vsel %vm524_vm8, %v526_v19, %v522_v36  ;;  %v546_v16 = vsel %vm545_vm9, %v658_v40, %v542_v26 }
  0xc8   :  { %530 = vst.msk [vmem:[#allocation5] sm:$0x1] %vm529_vm6, %v527_v55  ;;  %v551_v51 = vsel %vm548_vm10, %v550_v49, %v546_v16 }
  0xc9   :  { %553 = vst.msk [vmem:[#allocation5 + $0x1] sm:$0x1] %vm529_vm6, %v551_v51 }
  0xca   :  { %564 = dma.vmem_to_hbm [thread:$0]  %s560_s28, 32, %s562_s20, [#allocation3]  }
  0xcb   :  { %697 = dma.done.wait [#allocation3], 32  }
  0xcc   :  { %698 = vsyncadd [#allocation3], 4294967264 }
  0xcd   :  { %569 = vsyncpa [#allocation3], 1 }
  0xce   :  { %570 = vsyncpa [#allocation4], 1 }

</bundles_post_ra>
